<compile_context>
chip_gen: v7x
topology: tpu7x:2x2x1
jax: 0.10.0
libtpu: 0.0.40
codegen_flags: <defaults>
</compile_context>

<pallas_src>
import functools

import jax
import jax.numpy as jnp
from jax.experimental import pallas as pl
from jax.experimental.pallas import tpu as pltpu


# ------------------------------ small helpers ------------------------------ #

def _upsample_matrix(in_size, out_size):
    """Interpolation matrix matching F.interpolate(mode='bilinear', align_corners=False)."""
    j = jnp.arange(out_size, dtype=jnp.float32)
    src = (j + 0.5) * (in_size / out_size) - 0.5
    src = jnp.maximum(src, 0.0)
    i0 = jnp.clip(jnp.floor(src).astype(jnp.int32), 0, in_size - 1)
    i1 = jnp.minimum(i0 + 1, in_size - 1)
    w1 = src - i0.astype(jnp.float32)
    w0 = 1.0 - w1
    m = jnp.zeros((out_size, in_size), jnp.float32)
    rows = jnp.arange(out_size)
    m = m.at[rows, i0].add(w0)
    m = m.at[rows, i1].add(w1)
    return m


def _pick_tile(total, target, align):
    """Largest divisor of `total` that is <= target and (multiple of `align` or == total)."""
    best = None
    for d in range(1, total + 1):
        if total % d:
            continue
        if (d % align == 0 or d == total) and d <= target:
            if best is None or d > best:
                best = d
    return best if best is not None else total   # full-extent block is always legal


def _tpu_vmem_limit_bytes():
    """Generation-aware scoped-VMEM request: ~half of physical VMEM.

    v5e/v6e (128 MiB VMEM) -> 64 MiB, v7x (64 MiB VMEM) -> 32 MiB; conservative fallback."""
    try:
        cap = int(pltpu.get_tpu_info().vmem_capacity_bytes)
        if cap <= 0:
            raise ValueError("bad vmem capacity")
    except Exception:
        cap = 64 << 20
    return int(min(max(cap // 2, 16 << 20), 96 << 20))


# ----------------------------- Pallas kernels ------------------------------ #

def _attn_kernel(x_ref, wt_ref, g_ref, wphi_ref, bphi_ref, mh_ref, mw_ref,
                 wpsi_ref, bpsi_ref, o_ref, *, hg, wg):
    """Fused attention-map kernel on the down-sampled grid.

    Per grid step (= one batch image x one tile of TH2 down-sampled rows):
      x_ref   : (TH2*W2, kh*kw*C) bf16  patch-major strided-conv input (pure permutation
                                        of x: stride == kernel, so no im2col duplication)
      wt_ref  : (kh*kw*C, I)      bf16  theta weights
      g_ref   : (Hg*Wg, Cg)       bf16  gating signal (tiny, resident)
      wphi_ref: (Cg, I) bf16 ; bphi_ref: (1, I) f32
      mh_ref  : (TH2, Hg) f32           height-interp rows for this tile
      mw_ref  : (W2, Wg)  f32           width-interp matrix
      wpsi_ref: (1, I) f32 ; bpsi_ref : (1,) f32 scalar in SMEM
      o_ref   : (TH2, W2) f32           sigmoid(psi(relu(theta + phi_up)))  (lane-dense)
    """
    th2, w2 = o_ref.shape
    i_ch = wt_ref.shape[1]

    # theta: single bf16 MXU matmul with f32 accumulation, K = kh*kw*C.
    theta = jnp.dot(x_ref[...], wt_ref[...], preferred_element_type=jnp.float32)
    theta = theta.reshape(th2, w2, i_ch)

    # phi: 1x1 conv on the gating signal (+ bias).
    phi_g = jnp.dot(g_ref[...], wphi_ref[...],
                    preferred_element_type=jnp.float32) + bphi_ref[...]      # (Hg*Wg, I)

    # Separable bilinear upsample of phi onto this tile:
    #   width : Hg tiny (W2, Wg) @ (Wg, I) matmuls                (MXU)
    #   height: weighted sum over the Hg gating rows               (VPU broadcast-mul)
    mh = mh_ref[...]                                                         # (TH2, Hg)
    mw = mw_ref[...]                                                         # (W2, Wg)
    phi_up = None
    for h in range(hg):
        row = jnp.dot(mw, phi_g[h * wg:(h + 1) * wg, :],
                      preferred_element_type=jnp.float32)                    # (W2, I)
        contrib = mh[:, h:h + 1][:, :, None] * row[None, :, :]               # (TH2, W2, I)
        phi_up = contrib if phi_up is None else phi_up + contrib

    f = jnp.maximum(theta + phi_up, 0.0)

    # psi (I -> 1 channel): VPU multiply + lane reduction (no N=1 MXU matmul).
    logits = jnp.sum(f * wpsi_ref[...], axis=-1) + bpsi_ref[0]               # (TH2, W2)
    o_ref[...] = jax.nn.sigmoid(logits)


def _gate_kernel(x_ref, att_ref, w_ref, b_ref, o_ref):
    """Gating + 1x1 W conv + folded eval-mode BatchNorm, in NCHW orientation.

      x_ref  : (C, T) f32   original NCHW input, flattened spatial on lanes
      att_ref: (1, T) f32   upsampled attention, lane-dense, broadcast over channels
      w_ref  : (C, C) bf16  BN-folded W weight (out, in)
      b_ref  : (C, 1) f32   BN-folded bias
      o_ref  : (C, T) f32   W_y directly in NCHW layout
    """
    y = (x_ref[...] * att_ref[...]).astype(jnp.bfloat16)                     # (C, T)
    wy = jnp.dot(w_ref[...], y, preferred_element_type=jnp.float32)          # (C, T) f32
    o_ref[...] = wy + b_ref[...]


# ------------------------------- JAX glue ---------------------------------- #

def init_params(key, in_channels, gating_channels, inter_channels, sub_sample):
    kh, kw = sub_sample
    ks = jax.random.split(key, 8)

    def kaiming(k, shape, fan_in):
        return jax.random.normal(k, shape, jnp.float32) * jnp.sqrt(2.0 / fan_in)

    p = {}
    p["theta_w"] = kaiming(ks[0], (inter_channels, in_channels, kh, kw),
                           in_channels * kh * kw)
    p["phi_w"] = kaiming(ks[1], (inter_channels, gating_channels, 1, 1),
                         gating_channels)
    p["phi_b"] = jnp.zeros((inter_channels,), jnp.float32)
    p["psi_w"] = kaiming(ks[2], (1, inter_channels, 1, 1), inter_channels)
    p["psi_b"] = jnp.zeros((1,), jnp.float32)
    p["W_w"] = kaiming(ks[3], (in_channels, in_channels, 1, 1), in_channels)
    p["W_b"] = jnp.zeros((in_channels,), jnp.float32)
    # BatchNorm (eval mode): deterministic affine + running stats
    p["bn_gamma"] = 1.0 + 0.02 * jax.random.normal(ks[4], (in_channels,), jnp.float32)
    p["bn_beta"] = jnp.zeros((in_channels,), jnp.float32)
    p["bn_mean"] = jnp.zeros((in_channels,), jnp.float32)
    p["bn_var"] = jnp.ones((in_channels,), jnp.float32)
    return p


@functools.partial(jax.jit, static_argnames=("sub_sample",))
def grid_attention_forward(x, g, params, sub_sample=(2, 2)):
    """x: (B, C, H, W) NCHW, g: (B, Cg, Hg, Wg) NCHW. Returns (W_y, sigm_psi_f)."""
    B, C, H, W = x.shape
    _, Cg, Hg, Wg = g.shape
    kh, kw = sub_sample
    # TODO(synk): PyTorch's strided conv floors odd sizes; here exact division is required.
    assert H % kh == 0 and W % kw == 0
    H2, W2 = H // kh, W // kw
    HW = H * W
    I = params["theta_w"].shape[0]
    K = kh * kw * C

    vmem_limit = _tpu_vmem_limit_bytes()
    budget = vmem_limit // 2            # headroom for double-buffering / compiler scratch

    # ---------------- attention map on the down-sampled grid (fused kernel) ----------------
    # Rows-per-tile (TH2): as large as the VMEM budget allows (amortize the ~0.35us/step
    # overhead), but keep >= ~4 total grid steps so a v7x megacore can use both TCs, and
    # keep the (TH2*W2, K) block sublane-aligned (or full-extent).
    per_row_bytes = W2 * (4 * K + 12 * I + 8) + 4 * Hg
    cap_rows = max(1, budget // max(1, per_row_bytes))
    cap_steps = max(1, (B * H2) // 4)
    cap = min(cap_rows, cap_steps, H2)
    cands = [d for d in range(1, H2 + 1)
             if H2 % d == 0 and ((d * W2) % 8 == 0 or d == H2)]
    fitting = [d for d in cands if d <= cap]
    TH2 = max(fitting) if fitting else min(cands)
    rows = TH2 * W2

    # Patch-major bf16 view of x: (B, H2*W2, kh*kw*C). stride == kernel, so this is a
    # pure permutation of x (same element count), built in one XLA transpose+cast pass.
    x_pm = jnp.transpose(x.reshape(B, C, H2, kh, W2, kw), (0, 2, 4, 3, 5, 1))
    x_pm = x_pm.reshape(B, H2 * W2, K).astype(jnp.bfloat16)
    g3 = jnp.transpose(g, (0, 2, 3, 1)).reshape(B, Hg * Wg, Cg).astype(jnp.bfloat16)

    wt = jnp.transpose(params["theta_w"], (2, 3, 1, 0)).reshape(K, I).astype(jnp.bfloat16)
    wphi = jnp.transpose(params["phi_w"][:, :, 0, 0], (1, 0)).astype(jnp.bfloat16)  # (Cg, I)
    bphi = params["phi_b"].reshape(1, I)
    wpsi = params["psi_w"][0, :, 0, 0].reshape(1, I)
    bpsi = params["psi_b"].reshape(1)          # scalar, lives in SMEM

    # Separable bilinear (align_corners=False) factors for the phi upsample (Hg,Wg)->(H2,W2).
    mh2 = _upsample_matrix(Hg, H2).reshape(H2 // TH2, TH2, Hg)   # height, blocked per tile
    mw2 = _upsample_matrix(Wg, W2)                               # (W2, Wg) width

    n_att_steps = B * (H2 // TH2)
    attn_flops = int(2 * B * H2 * W2 * K * I          # theta
                     + 2 * B * Hg * Wg * Cg * I       # phi 1x1
                     + 2 * B * Hg * W2 * Wg * I       # width interp
                     + 2 * B * H2 * W2 * Hg * I       # height interp
                     + 4 * B * H2 * W2 * I)           # relu + psi
    attn_bytes = int(2 * B * H * W * C + 4 * B * H2 * W2
                     + n_att_steps * (2 * Hg * Wg * Cg + 4 * TH2 * Hg)
                     + 2 * K * I + 4 * W2 * Wg)

    att4 = pl.pallas_call(
        functools.partial(_attn_kernel, hg=Hg, wg=Wg),
        out_shape=jax.ShapeDtypeStruct((B, H2 // TH2, TH2, W2), jnp.float32),
        grid=(B, H2 // TH2),
        in_specs=[
            pl.BlockSpec((None, rows, K), lambda b, i: (b, i, 0)),
            pl.BlockSpec((K, I), lambda b, i: (0, 0)),
            pl.BlockSpec((None, Hg * Wg, Cg), lambda b, i: (b, 0, 0)),
            pl.BlockSpec((Cg, I), lambda b, i: (0, 0)),
            pl.BlockSpec((1, I), lambda b, i: (0, 0)),
            pl.BlockSpec((None, TH2, Hg), lambda b, i: (i, 0, 0)),
            pl.BlockSpec((W2, Wg), lambda b, i: (0, 0)),
            pl.BlockSpec((1, I), lambda b, i: (0, 0)),
            pl.BlockSpec(memory_space=pltpu.MemorySpace.SMEM),
        ],
        out_specs=pl.BlockSpec((None, None, TH2, W2), lambda b, i: (b, i, 0, 0)),
        compiler_params=pltpu.CompilerParams(
            dimension_semantics=("parallel", "parallel"),
            vmem_limit_bytes=vmem_limit),
        cost_estimate=pl.CostEstimate(flops=attn_flops,
                                      transcendentals=int(B * H2 * W2),
                                      bytes_accessed=attn_bytes),
    )(x_pm, wt, g3, wphi, bphi, mh2, mw2, wpsi, bpsi)

    # Attention upsample to input resolution.  Interpolation weights are data independent,
    # so this small op stays in plain XLA; the result is consumed lane-dense (1, TILE) by
    # the gating kernel and is also returned as sigm_psi_f.
    att_s = att4.reshape(B, H2, W2)
    mhA = _upsample_matrix(H2, H)
    mwA = _upsample_matrix(W2, W)
    att_up = jnp.einsum("Oh,bhw,Pw->bOP", mhA, att_s, mwA)            # (B, H, W) f32

    # ---------------- gating + W (1x1 conv) + BatchNorm(eval), NCHW orientation ----------------
    scale = params["bn_gamma"] * jax.lax.rsqrt(params["bn_var"] + 1e-5)
    w_eff = (params["W_w"][:, :, 0, 0] * scale[:, None]).astype(jnp.bfloat16)   # (Cout, Cin)
    b_eff = ((params["W_b"] - params["bn_mean"]) * scale + params["bn_beta"]).reshape(C, 1)

    x2 = x.reshape(B, C, HW)            # free view of the original NCHW input (f32 read)
    att2 = att_up.reshape(B, 1, HW)     # lane-dense attention rows

    # Spatial tile (TR): this kernel is HBM-bound everywhere, so use the biggest tile the
    # VMEM budget allows while keeping >= ~4 total steps for the v7x megacore.
    per_col_bytes = 18 * C + 8
    cap_cols = max(128, budget // max(1, per_col_bytes))
    cap_steps_g = max(128, (B * HW) // 4)
    TR = _pick_tile(HW, max(128, min(cap_cols, cap_steps_g)), 128)

    n_gate_steps = B * (HW // TR)
    gate_flops = int(2 * B * HW * C * C + 2 * B * HW * C)
    gate_bytes = int(8 * B * C * HW + 4 * B * HW + n_gate_steps * (2 * C * C + 4 * C))

    wy2 = pl.pallas_call(
        _gate_kernel,
        out_shape=jax.ShapeDtypeStruct((B, C, HW), jnp.float32),
        grid=(B, HW // TR),
        in_specs=[
            pl.BlockSpec((None, C, TR), lambda b, j: (b, 0, j)),
            pl.BlockSpec((None, 1, TR), lambda b, j: (b, 0, j)),
            pl.BlockSpec((C, C), lambda b, j: (0, 0)),
            pl.BlockSpec((C, 1), lambda b, j: (0, 0)),
        ],
        out_specs=pl.BlockSpec((None, C, TR), lambda b, j: (b, 0, j)),
        compiler_params=pltpu.CompilerParams(
            dimension_semantics=("parallel", "parallel"),
            vmem_limit_bytes=vmem_limit),
        cost_estimate=pl.CostEstimate(flops=gate_flops, transcendentals=0,
                                      bytes_accessed=gate_bytes),
    )(x2, att2, w_eff, b_eff)

    W_y = wy2.reshape(B, C, H, W)                   # already NCHW, no transpose
    sigm_psi_f = att_up.reshape(B, 1, H, W)
    return W_y, sigm_psi_f


# ------------------------- pure-JAX reference (f32) ------------------------- #

def _reference_forward(x, g, params, sub_sample):
    kh, kw = sub_sample
    B, C, H, W = x.shape
    _, Cg, Hg, Wg = g.shape
    H2, W2 = H // kh, W // kw
    xp = x.reshape(B, C, H2, kh, W2, kw)
    theta = jnp.einsum("icuv,bchuwv->bihw", params["theta_w"], xp)
    phi = jnp.einsum("ic,bchw->bihw", params["phi_w"][:, :, 0, 0], g) \
        + params["phi_b"][None, :, None, None]
    mh2 = _upsample_matrix(Hg, H2)
    mw2 = _upsample_matrix(Wg, W2)
    phi_up = jnp.einsum("Oh,bihw,Pw->biOP", mh2, phi, mw2)
    f = jnp.maximum(theta + phi_up, 0.0)
    logits = jnp.einsum("i,bihw->bhw", params["psi_w"][0, :, 0, 0], f) + params["psi_b"][0]
    att = jax.nn.sigmoid(logits)
    mhA = _upsample_matrix(H2, H)
    mwA = _upsample_matrix(W2, W)
    att_up = jnp.einsum("Oh,bhw,Pw->bOP", mhA, att, mwA)
    y = att_up[:, None, :, :] * x
    wy = jnp.einsum("oc,bchw->bohw", params["W_w"][:, :, 0, 0], y) \
        + params["W_b"][None, :, None, None]
    scale = params["bn_gamma"] * jax.lax.rsqrt(params["bn_var"] + 1e-5)
    wy = (wy - params["bn_mean"][None, :, None, None]) * scale[None, :, None, None] \
        + params["bn_beta"][None, :, None, None]
    return wy, att_up[:, None]


if __name__ == "__main__":
    # Small shapes consistent with the module (dimension=2, sub_sample_factor=(2, 2)).
    B, C, H, W = 2, 4, 16, 16          # in_channels = 4 -> inter_channels = 2
    Cg, Hg, Wg = 8, 4, 4               # gating_channels = 8
    inter = C // 2

    key = jax.random.PRNGKey(0)
    kx, kg, kp = jax.random.split(key, 3)
    x = jax.random.normal(kx, (B, C, H, W), jnp.float32)
    g = jax.random.normal(kg, (B, Cg, Hg, Wg), jnp.float32)
    params = init_params(kp, C, Cg, inter, (2, 2))

    W_y, sigm_psi_f = grid_attention_forward(x, g, params, sub_sample=(2, 2))
    jax.block_until_ready((W_y, sigm_psi_f))

    assert W_y.shape == (B, C, H, W)
    assert sigm_psi_f.shape == (B, 1, H, W)

    # Numerical sanity check against a pure-JAX reference (bf16 operands => loose tol).
    ref_wy, ref_att = _reference_forward(x, g, params, (2, 2))
    assert jnp.allclose(sigm_psi_f, ref_att, atol=1e-1, rtol=1e-1)
    assert jnp.allclose(W_y, ref_wy, atol=1e-1, rtol=1e-1)

    print("KERNEL_OK")
</pallas_src>

<mosaic_0001>
module attributes {stable_mosaic.version = 11 : i64} {
  func.func private @main(%arg0: i32) attributes {dimension_semantics = [#tpu.dimension_semantics<core_parallel>], iteration_bounds = array<i64: 2>, tpu.core_type = #tpu.core_type<sc_scalar_subcore>, window_params = []} {
    return
  }
}

module attributes {stable_mosaic.version = 11 : i64} {
  func.func private @main(%arg0: i32) attributes {dimension_semantics = [#tpu.dimension_semantics<core_parallel>], iteration_bounds = array<i64: 2>, tpu.core_type = #tpu.core_type<sc_scalar_subcore>, window_params = []} {
    return
  }
}

module attributes {stable_mosaic.version = 11 : i64} {
  func.func @_attn_kernel(%arg0: i32, %arg1: i32, %arg2: memref<1x32x16xbf16, #tpu.memory_space<vmem>>, %arg3: memref<16x2xbf16, #tpu.memory_space<vmem>>, %arg4: memref<1x16x8xbf16, #tpu.memory_space<vmem>>, %arg5: memref<8x2xbf16, #tpu.memory_space<vmem>>, %arg6: memref<1x2xf32, #tpu.memory_space<vmem>>, %arg7: memref<1x4x4xf32, #tpu.memory_space<vmem>>, %arg8: memref<8x4xf32, #tpu.memory_space<vmem>>, %arg9: memref<1x2xf32, #tpu.memory_space<vmem>>, %arg10: memref<1xf32, #tpu.memory_space<smem>>, %arg11: memref<1x1x4x8xf32, #tpu.memory_space<vmem>>) attributes {dimension_semantics = [#tpu.dimension_semantics<parallel>, #tpu.dimension_semantics<parallel>], iteration_bounds = array<i64: 2, 2>, scalar_prefetch = 0 : i64, scratch_operands = 0 : i64, tpu.core_type = #tpu.core_type<tc>, window_params = [{transform_indices = @transform_0, window_bounds = array<i64: 1, 32, 16>}, {pipeline_mode = #tpu.pipeline_mode<synchronous>, transform_indices = @transform_1, window_bounds = array<i64: 16, 2>}, {transform_indices = @transform_2, window_bounds = array<i64: 1, 16, 8>}, {pipeline_mode = #tpu.pipeline_mode<synchronous>, transform_indices = @transform_3, window_bounds = array<i64: 8, 2>}, {pipeline_mode = #tpu.pipeline_mode<synchronous>, transform_indices = @transform_4, window_bounds = array<i64: 1, 2>}, {transform_indices = @transform_5, window_bounds = array<i64: 1, 4, 4>}, {pipeline_mode = #tpu.pipeline_mode<synchronous>, transform_indices = @transform_6, window_bounds = array<i64: 8, 4>}, {pipeline_mode = #tpu.pipeline_mode<synchronous>, transform_indices = @transform_7, window_bounds = array<i64: 1, 2>}, {transform_indices = @transform_8, window_bounds = array<i64: 1>}, {transform_indices = @transform_9, window_bounds = array<i64: 1, 1, 4, 8>}]} {
    %c0 = arith.constant 0 : index
    %c0_0 = arith.constant 0 : index
    %c0_1 = arith.constant 0 : index
    %0 = vector.load %arg2[%c0, %c0_0, %c0_1] : memref<1x32x16xbf16, #tpu.memory_space<vmem>>, vector<1x32x16xbf16>
    %1 = vector.shape_cast %0 : vector<1x32x16xbf16> to vector<32x16xbf16>
    %c0_2 = arith.constant 0 : index
    %c0_3 = arith.constant 0 : index
    %2 = vector.load %arg3[%c0_2, %c0_3] : memref<16x2xbf16, #tpu.memory_space<vmem>>, vector<16x2xbf16>
    %cst = arith.constant dense<0.000000e+00> : vector<32x2xf32>
    %3 = tpu.matmul %1, %2, %cst {dimension_numbers = #tpu.dot_dimension_numbers<[1], [0], [0], [1], [0, 0, 1, 1], [], []>} : vector<32x16xbf16>, vector<16x2xbf16>, vector<32x2xf32> -> vector<32x2xf32>
    %4 = vector.shape_cast %3 : vector<32x2xf32> to vector<4x8x2xf32>
    %c0_4 = arith.constant 0 : index
    %c0_5 = arith.constant 0 : index
    %c0_6 = arith.constant 0 : index
    %5 = vector.load %arg4[%c0_4, %c0_5, %c0_6] : memref<1x16x8xbf16, #tpu.memory_space<vmem>>, vector<1x16x8xbf16>
    %6 = vector.shape_cast %5 : vector<1x16x8xbf16> to vector<16x8xbf16>
    %c0_7 = arith.constant 0 : index
    %c0_8 = arith.constant 0 : index
    %7 = vector.load %arg5[%c0_7, %c0_8] : memref<8x2xbf16, #tpu.memory_space<vmem>>, vector<8x2xbf16>
    %cst_9 = arith.constant dense<0.000000e+00> : vector<16x2xf32>
    %8 = tpu.matmul %6, %7, %cst_9 {dimension_numbers = #tpu.dot_dimension_numbers<[1], [0], [0], [1], [0, 0, 1, 1], [], []>} : vector<16x8xbf16>, vector<8x2xbf16>, vector<16x2xf32> -> vector<16x2xf32>
    %c0_10 = arith.constant 0 : index
    %c0_11 = arith.constant 0 : index
    %9 = vector.load %arg6[%c0_10, %c0_11] : memref<1x2xf32, #tpu.memory_space<vmem>>, vector<1x2xf32>
    %10 = vector.broadcast %9 : vector<1x2xf32> to vector<16x2xf32>
    %11 = arith.addf %8, %10 : vector<16x2xf32>
    %c0_12 = arith.constant 0 : index
    %c0_13 = arith.constant 0 : index
    %c0_14 = arith.constant 0 : index
    %12 = vector.load %arg7[%c0_12, %c0_13, %c0_14] : memref<1x4x4xf32, #tpu.memory_space<vmem>>, vector<1x4x4xf32>
    %13 = vector.shape_cast %12 : vector<1x4x4xf32> to vector<4x4xf32>
    %c0_15 = arith.constant 0 : index
    %c0_16 = arith.constant 0 : index
    %14 = vector.load %arg8[%c0_15, %c0_16] : memref<8x4xf32, #tpu.memory_space<vmem>>, vector<8x4xf32>
    %15 = vector.extract_strided_slice %11 {offsets = [0, 0], sizes = [4, 2], strides = [1, 1]} : vector<16x2xf32> to vector<4x2xf32>
    %cst_17 = arith.constant dense<0.000000e+00> : vector<8x2xf32>
    %16 = tpu.matmul %14, %15, %cst_17 {dimension_numbers = #tpu.dot_dimension_numbers<[1], [0], [0], [1], [0, 0, 1, 1], [], []>} : vector<8x4xf32>, vector<4x2xf32>, vector<8x2xf32> -> vector<8x2xf32>
    %17 = vector.extract_strided_slice %13 {offsets = [0, 0], sizes = [4, 1], strides = [1, 1]} : vector<4x4xf32> to vector<4x1xf32>
    %18 = vector.shape_cast %17 : vector<4x1xf32> to vector<4x1x1xf32>
    %19 = vector.shape_cast %16 : vector<8x2xf32> to vector<1x8x2xf32>
    %20 = vector.broadcast %18 : vector<4x1x1xf32> to vector<4x8x2xf32>
    %21 = vector.broadcast %19 : vector<1x8x2xf32> to vector<4x8x2xf32>
    %22 = arith.mulf %20, %21 : vector<4x8x2xf32>
    %23 = vector.extract_strided_slice %11 {offsets = [4, 0], sizes = [4, 2], strides = [1, 1]} : vector<16x2xf32> to vector<4x2xf32>
    %cst_18 = arith.constant dense<0.000000e+00> : vector<8x2xf32>
    %24 = tpu.matmul %14, %23, %cst_18 {dimension_numbers = #tpu.dot_dimension_numbers<[1], [0], [0], [1], [0, 0, 1, 1], [], []>} : vector<8x4xf32>, vector<4x2xf32>, vector<8x2xf32> -> vector<8x2xf32>
    %25 = vector.extract_strided_slice %13 {offsets = [0, 1], sizes = [4, 1], strides = [1, 1]} : vector<4x4xf32> to vector<4x1xf32>
    %26 = vector.shape_cast %25 : vector<4x1xf32> to vector<4x1x1xf32>
    %27 = vector.shape_cast %24 : vector<8x2xf32> to vector<1x8x2xf32>
    %28 = vector.broadcast %26 : vector<4x1x1xf32> to vector<4x8x2xf32>
    %29 = vector.broadcast %27 : vector<1x8x2xf32> to vector<4x8x2xf32>
    %30 = arith.mulf %28, %29 : vector<4x8x2xf32>
    %31 = arith.addf %22, %30 : vector<4x8x2xf32>
    %32 = vector.extract_strided_slice %11 {offsets = [8, 0], sizes = [4, 2], strides = [1, 1]} : vector<16x2xf32> to vector<4x2xf32>
    %cst_19 = arith.constant dense<0.000000e+00> : vector<8x2xf32>
    %33 = tpu.matmul %14, %32, %cst_19 {dimension_numbers = #tpu.dot_dimension_numbers<[1], [0], [0], [1], [0, 0, 1, 1], [], []>} : vector<8x4xf32>, vector<4x2xf32>, vector<8x2xf32> -> vector<8x2xf32>
    %34 = vector.extract_strided_slice %13 {offsets = [0, 2], sizes = [4, 1], strides = [1, 1]} : vector<4x4xf32> to vector<4x1xf32>
    %35 = vector.shape_cast %34 : vector<4x1xf32> to vector<4x1x1xf32>
    %36 = vector.shape_cast %33 : vector<8x2xf32> to vector<1x8x2xf32>
    %37 = vector.broadcast %35 : vector<4x1x1xf32> to vector<4x8x2xf32>
    %38 = vector.broadcast %36 : vector<1x8x2xf32> to vector<4x8x2xf32>
    %39 = arith.mulf %37, %38 : vector<4x8x2xf32>
    %40 = arith.addf %31, %39 : vector<4x8x2xf32>
    %41 = vector.extract_strided_slice %11 {offsets = [12, 0], sizes = [4, 2], strides = [1, 1]} : vector<16x2xf32> to vector<4x2xf32>
    %cst_20 = arith.constant dense<0.000000e+00> : vector<8x2xf32>
    %42 = tpu.matmul %14, %41, %cst_20 {dimension_numbers = #tpu.dot_dimension_numbers<[1], [0], [0], [1], [0, 0, 1, 1], [], []>} : vector<8x4xf32>, vector<4x2xf32>, vector<8x2xf32> -> vector<8x2xf32>
    %43 = vector.extract_strided_slice %13 {offsets = [0, 3], sizes = [4, 1], strides = [1, 1]} : vector<4x4xf32> to vector<4x1xf32>
    %44 = vector.shape_cast %43 : vector<4x1xf32> to vector<4x1x1xf32>
    %45 = vector.shape_cast %42 : vector<8x2xf32> to vector<1x8x2xf32>
    %46 = vector.broadcast %44 : vector<4x1x1xf32> to vector<4x8x2xf32>
    %47 = vector.broadcast %45 : vector<1x8x2xf32> to vector<4x8x2xf32>
    %48 = arith.mulf %46, %47 : vector<4x8x2xf32>
    %49 = arith.addf %40, %48 : vector<4x8x2xf32>
    %50 = arith.addf %4, %49 : vector<4x8x2xf32>
    %cst_21 = arith.constant 0.000000e+00 : f32
    %51 = vector.broadcast %cst_21 : f32 to vector<4x8x2xf32>
    %52 = arith.maximumf %50, %51 : vector<4x8x2xf32>
    %c0_22 = arith.constant 0 : index
    %c0_23 = arith.constant 0 : index
    %53 = vector.load %arg9[%c0_22, %c0_23] : memref<1x2xf32, #tpu.memory_space<vmem>>, vector<1x2xf32>
    %54 = vector.shape_cast %53 : vector<1x2xf32> to vector<1x1x2xf32>
    %55 = vector.broadcast %54 : vector<1x1x2xf32> to vector<4x8x2xf32>
    %56 = arith.mulf %52, %55 : vector<4x8x2xf32>
    %cst_24 = arith.constant dense<0.000000e+00> : vector<4x8xf32>
    %57 = vector.multi_reduction <add>, %56, %cst_24 [2] : vector<4x8x2xf32> to vector<4x8xf32>
    %c0_25 = arith.constant 0 : index
    %58 = memref.load %arg10[%c0_25] : memref<1xf32, #tpu.memory_space<smem>>
    %59 = vector.broadcast %58 : f32 to vector<4x8xf32>
    %60 = arith.addf %57, %59 : vector<4x8xf32>
    %61 = arith.negf %60 : vector<4x8xf32>
    %62 = math.exp %61 : vector<4x8xf32>
    %cst_26 = arith.constant 1.000000e+00 : f32
    %63 = vector.broadcast %cst_26 : f32 to vector<4x8xf32>
    %64 = arith.addf %63, %62 : vector<4x8xf32>
    %65 = arith.divf %63, %64 : vector<4x8xf32>
    %c0_27 = arith.constant 0 : index
    %c0_28 = arith.constant 0 : index
    %c0_29 = arith.constant 0 : index
    %c0_30 = arith.constant 0 : index
    %66 = vector.load %arg11[%c0_27, %c0_28, %c0_29, %c0_30] : memref<1x1x4x8xf32, #tpu.memory_space<vmem>>, vector<1x1x4x8xf32>
    %67 = vector.shape_cast %66 : vector<1x1x4x8xf32> to vector<4x8xf32>
    %68 = vector.shape_cast %65 : vector<4x8xf32> to vector<1x1x4x8xf32>
    tpu.vector_store %arg11[%c0_27, %c0_28, %c0_29, %c0_30], %68 {strides = array<i32>} : memref<1x1x4x8xf32, #tpu.memory_space<vmem>>, vector<1x1x4x8xf32>,
    return
  }
  func.func @transform_0(%arg0: i32, %arg1: i32) -> (i32, i32, i32) {
    %c0_i32 = arith.constant 0 : i32
    %c0_i32_0 = arith.constant 0 : i32
    return %arg0, %arg1, %c0_i32 : i32, i32, i32
  }
  func.func @transform_1(%arg0: i32, %arg1: i32) -> (i32, i32) {
    %c0_i32 = arith.constant 0 : i32
    %c0_i32_0 = arith.constant 0 : i32
    %c0_i32_1 = arith.constant 0 : i32
    return %c0_i32, %c0_i32_0 : i32, i32
  }
  func.func @transform_2(%arg0: i32, %arg1: i32) -> (i32, i32, i32) {
    %c0_i32 = arith.constant 0 : i32
    %c0_i32_0 = arith.constant 0 : i32
    %c0_i32_1 = arith.constant 0 : i32
    return %arg0, %c0_i32, %c0_i32_0 : i32, i32, i32
  }
  func.func @transform_3(%arg0: i32, %arg1: i32) -> (i32, i32) {
    %c0_i32 = arith.constant 0 : i32
    %c0_i32_0 = arith.constant 0 : i32
    %c0_i32_1 = arith.constant 0 : i32
    return %c0_i32, %c0_i32_0 : i32, i32
  }
  func.func @transform_4(%arg0: i32, %arg1: i32) -> (i32, i32) {
    %c0_i32 = arith.constant 0 : i32
    %c0_i32_0 = arith.constant 0 : i32
    %c0_i32_1 = arith.constant 0 : i32
    return %c0_i32, %c0_i32_0 : i32, i32
  }
  func.func @transform_5(%arg0: i32, %arg1: i32) -> (i32, i32, i32) {
    %c0_i32 = arith.constant 0 : i32
    %c0_i32_0 = arith.constant 0 : i32
    %c0_i32_1 = arith.constant 0 : i32
    return %arg1, %c0_i32, %c0_i32_0 : i32, i32, i32
  }
  func.func @transform_6(%arg0: i32, %arg1: i32) -> (i32, i32) {
    %c0_i32 = arith.constant 0 : i32
    %c0_i32_0 = arith.constant 0 : i32
    %c0_i32_1 = arith.constant 0 : i32
    return %c0_i32, %c0_i32_0 : i32, i32
  }
  func.func @transform_7(%arg0: i32, %arg1: i32) -> (i32, i32) {
    %c0_i32 = arith.constant 0 : i32
    %c0_i32_0 = arith.constant 0 : i32
    %c0_i32_1 = arith.constant 0 : i32
    return %c0_i32, %c0_i32_0 : i32, i32
  }
  func.func @transform_8(%arg0: i32, %arg1: i32) -> i32 {
    %c0_i32 = arith.constant 0 : i32
    %c0_i32_0 = arith.constant 0 : i32
    return %c0_i32 : i32
  }
  func.func @transform_9(%arg0: i32, %arg1: i32) -> (i32, i32, i32, i32) {
    %c0_i32 = arith.constant 0 : i32
    %c0_i32_0 = arith.constant 0 : i32
    %c0_i32_1 = arith.constant 0 : i32
    return %arg0, %arg1, %c0_i32, %c0_i32_0 : i32, i32, i32, i32
  }
}

module attributes {stable_mosaic.version = 11 : i64} {
  func.func @_gate_kernel(%arg0: i32, %arg1: i32, %arg2: memref<1x4x128xf32, #tpu.memory_space<vmem>>, %arg3: memref<1x1x128xf32, #tpu.memory_space<vmem>>, %arg4: memref<4x4xbf16, #tpu.memory_space<vmem>>, %arg5: memref<4x1xf32, #tpu.memory_space<vmem>>, %arg6: memref<1x4x128xf32, #tpu.memory_space<vmem>>) attributes {dimension_semantics = [#tpu.dimension_semantics<parallel>, #tpu.dimension_semantics<parallel>], iteration_bounds = array<i64: 2, 2>, scalar_prefetch = 0 : i64, scratch_operands = 0 : i64, tpu.core_type = #tpu.core_type<tc>, window_params = [{transform_indices = @transform_0, window_bounds = array<i64: 1, 4, 128>}, {transform_indices = @transform_1, window_bounds = array<i64: 1, 1, 128>}, {pipeline_mode = #tpu.pipeline_mode<synchronous>, transform_indices = @transform_2, window_bounds = array<i64: 4, 4>}, {pipeline_mode = #tpu.pipeline_mode<synchronous>, transform_indices = @transform_3, window_bounds = array<i64: 4, 1>}, {transform_indices = @transform_4, window_bounds = array<i64: 1, 4, 128>}]} {
    %c0 = arith.constant 0 : index
    %c0_0 = arith.constant 0 : index
    %c0_1 = arith.constant 0 : index
    %0 = vector.load %arg2[%c0, %c0_0, %c0_1] : memref<1x4x128xf32, #tpu.memory_space<vmem>>, vector<1x4x128xf32>
    %1 = vector.shape_cast %0 : vector<1x4x128xf32> to vector<4x128xf32>
    %c0_2 = arith.constant 0 : index
    %c0_3 = arith.constant 0 : index
    %c0_4 = arith.constant 0 : index
    %2 = vector.load %arg3[%c0_2, %c0_3, %c0_4] : memref<1x1x128xf32, #tpu.memory_space<vmem>>, vector<1x1x128xf32>
    %3 = vector.shape_cast %2 : vector<1x1x128xf32> to vector<1x128xf32>
    %4 = vector.broadcast %3 : vector<1x128xf32> to vector<4x128xf32>
    %5 = arith.mulf %1, %4 : vector<4x128xf32>
    %6 = arith.truncf %5 : vector<4x128xf32> to vector<4x128xbf16>
    %c0_5 = arith.constant 0 : index
    %c0_6 = arith.constant 0 : index
    %7 = vector.load %arg4[%c0_5, %c0_6] : memref<4x4xbf16, #tpu.memory_space<vmem>>, vector<4x4xbf16>
    %cst = arith.constant dense<0.000000e+00> : vector<4x128xf32>
    %8 = tpu.matmul %7, %6, %cst {dimension_numbers = #tpu.dot_dimension_numbers<[1], [0], [0], [1], [0, 0, 1, 1], [], []>} : vector<4x4xbf16>, vector<4x128xbf16>, vector<4x128xf32> -> vector<4x128xf32>
    %c0_7 = arith.constant 0 : index
    %c0_8 = arith.constant 0 : index
    %9 = vector.load %arg5[%c0_7, %c0_8] : memref<4x1xf32, #tpu.memory_space<vmem>>, vector<4x1xf32>
    %10 = vector.broadcast %9 : vector<4x1xf32> to vector<4x128xf32>
    %11 = arith.addf %8, %10 : vector<4x128xf32>
    %c0_9 = arith.constant 0 : index
    %c0_10 = arith.constant 0 : index
    %c0_11 = arith.constant 0 : index
    %12 = vector.load %arg6[%c0_9, %c0_10, %c0_11] : memref<1x4x128xf32, #tpu.memory_space<vmem>>, vector<1x4x128xf32>
    %13 = vector.shape_cast %12 : vector<1x4x128xf32> to vector<4x128xf32>
    %14 = vector.shape_cast %11 : vector<4x128xf32> to vector<1x4x128xf32>
    tpu.vector_store %arg6[%c0_9, %c0_10, %c0_11], %14 {strides = array<i32>} : memref<1x4x128xf32, #tpu.memory_space<vmem>>, vector<1x4x128xf32>,
    return
  }
  func.func @transform_0(%arg0: i32, %arg1: i32) -> (i32, i32, i32) {
    %c0_i32 = arith.constant 0 : i32
    %c0_i32_0 = arith.constant 0 : i32
    return %arg0, %c0_i32, %arg1 : i32, i32, i32
  }
  func.func @transform_1(%arg0: i32, %arg1: i32) -> (i32, i32, i32) {
    %c0_i32 = arith.constant 0 : i32
    %c0_i32_0 = arith.constant 0 : i32
    return %arg0, %c0_i32, %arg1 : i32, i32, i32
  }
  func.func @transform_2(%arg0: i32, %arg1: i32) -> (i32, i32) {
    %c0_i32 = arith.constant 0 : i32
    %c0_i32_0 = arith.constant 0 : i32
    %c0_i32_1 = arith.constant 0 : i32
    return %c0_i32, %c0_i32_0 : i32, i32
  }
  func.func @transform_3(%arg0: i32, %arg1: i32) -> (i32, i32) {
    %c0_i32 = arith.constant 0 : i32
    %c0_i32_0 = arith.constant 0 : i32
    %c0_i32_1 = arith.constant 0 : i32
    return %c0_i32, %c0_i32_0 : i32, i32
  }
  func.func @transform_4(%arg0: i32, %arg1: i32) -> (i32, i32, i32) {
    %c0_i32 = arith.constant 0 : i32
    %c0_i32_0 = arith.constant 0 : i32
    return %arg0, %c0_i32, %arg1 : i32, i32, i32
  }
}

</mosaic_0001>

<bundles_post_ra>
// kernel: grid_attention_forward.3
= control target key start
LH: loop header
LB: loop body
LE: loop exit
PB: predicated region body
PF: predicated region fallthrough
CT: control target
= control target key end

     0   :  { %s559_s15 = smov 0   ;;  %s561_s16 = smov 0   ;;  %s619_s0 = inlined_call_operand.vmem [shape: f32[2,4,256], index: 0, kind: input, shape index: {}]   ;;  %s620_s1 = inlined_call_operand.vmem [shape: f32[2,1,256], index: 1, kind: input, shape index: {}]   ;;  %s621_s2 = inlined_call_operand.vmem [shape: bf16[4,4], index: 2, kind: input, shape index: {}]   ;;  %s622_s3 = inlined_call_operand.vmem [shape: f32[4,1], index: 3, kind: input, shape index: {}]   ;;  %s623_s4 = inlined_call_operand.vmem [shape: f32[2,4,256], index: 4, kind: output, shape index: {}]  }
   0x1   :  { %s563_s17 = smov 0   ;;  %s565_s18 = smov 0  }
   0x2   :  { %s567_s19 = smov 0  }
   0x3 LB: > { %s23_s20 = sadd.s32 1, %s521_s17  ;;  %s26_s21 = sadd.s32 1, %s525_s18  ;;  %s529_s19 = sphi %s567_s19, %s14_s19   ;;  %s525_s18 = sphi %s565_s18, %s627_s18   ;;  %s521_s17 = sphi %s563_s17, %s626_s17   ;;  %s517_s16 = sphi %s561_s16, %s625_s16   ;;  %s513_s15 = sphi %s559_s15, %s624_s15  }
   0x4   : > { %p24_p0 = scmp.ge.s32.totalorder %s23_s20, 2  ;;  %p429_p1 = scmp.ge.s32.totalorder %s529_s19, 1 }
   0x5   : > { %p195_p2 = scmp.lt.s32.totalorder %s529_s19, 5 }
   0x6   : > { %s629_s20 = smov (%p24_p0, %s23_s20), 0  ;;  %s631_s21 = smov (!%p24_p0, %s26_s21), %s525_s18 }
   0x7   : > { %p196_p3 = pnand %p429_p1, %p195_p2  ;;  %p28_p4 = scmp.ge.s32.totalorder %s631_s21, 2 }
   0x8   : > { %p234_p5 = scmp.lt.s32.totalorder (!%p196_p3), %s517_s16, 1  ;;  %p236_p6 = scmp.lt.s32.totalorder (!%p196_p3), %s513_s15, 1  ;;  %v531_v0 = vmov (!%p196_p3), 0.0   ;;  %vm532_vm0 = vmmov (!%p196_p3), 0   ;;  %v269_v1 = vld [vmem:[%s622_s3] sm:$0xf] (!%p196_p3) }
   0x9   : > { %s633_s21 = smov (%p28_p4, %s631_s21), 0  ;;  %199 = sbr.rel (%p196_p3) target bundleno = 245 (0xf5), region = 36 }
   0xa   : > { %441 = vmatprep.subr.bf16.mxu0 (!%p196_p3), %v531_v0  ;;  %443 = vmatprep.mubr.msk.bf16.mxu0 (!%p196_p3), %vm532_vm0, %v531_v0  ;;  %v533_v2 = vmov (!%p196_p3), 0   ;;  %vm279_vm1 = vcmask (!%p196_p3), 1041408   ;;  %v268_v8 = vld [vmem:[%s621_s2] sm:$0x3] (!%p196_p3)  ;;  %vm275_vm2 = vcmask (!%p196_p3), 31744  }
   0xb   : > { %490 = vset.pattern.permute.xlu0 (!%p196_p3), %v533_v2 }
   0xc   : > { %272 = vperm.xlu0 (!%p196_p3), %490, %v269_v1  }
  0x10   : > { %s635_s16 = smov (!%p234_p5, %s517_s16), 1  ;;  %s637_s15 = smov (!%p236_p6, %s513_s15), 1 }
  0x11   : > { %s430_s24 = sshll.u32 %s635_s16, 1 }
  0x12   : > { %s239_s25 = sadd.s32 %s430_s24, %s637_s15 }
  0x13   : > { %s431_s26 = sshll.u32 %s239_s25, 2  ;;  %s248_s29 = scalar_lea.vmem %s620_s1, %s239_s25 }
  0x14   : > { %s241_s6 = scalar_lea.vmem %s619_s0, %s431_s26  ;;  %v435_v3 = vld [vmem:[%s248_s29] ss:$0 sm:$0xff]  ;;  %s256_s11 = scalar_lea.vmem %s623_s4, %s431_s26 }
  0x15   : > { %v258_v4 = vld [vmem:[%s241_s6] sm:$0xf] }
  0x16   : > { %v266_v5 = vmul.f32 %v435_v3, %v258_v4 }
  0x18   : > { %v267_v6 = vpack.c.bf16 %v266_v5, %v266_v5 }
  0x1a   : > { %v281_v7 = vsel %vm279_vm1, %v267_v6, 0 }
  0x1b   : > { %442 = vmatpush3.bf16.msra.mxu0 %v281_v7 }
  0x1e   : > { %444 = vmatmul.mubr.msk.bf16.vlgmr.msra.gmra.mrb[0].mxu0 %vm275_vm2, %v268_v8 }
  0x8b   : > { %v273_v9 = vpop.permute.xlu0 %272 }
  0xf1   : > { %v317_v10 = vpop.f32.mrb[0].mxu0 }
  0xf2   : > { %v318_v11 = vadd.f32 %v317_v10, %v273_v9  ;;  %v445_v12 = vpop.f32.mrb[1].mxu0 }
  0xf3   : > { %v320_v13 = vpop.f32.mrb[2].mxu0 }
  0xf4   : > { %323 = vst [vmem:[%s256_s11] sm:$0xf] %v318_v11  ;;  %v446_v14 = vpop.f32.mrb[3].mxu0 }
  0xf5 PF: > { %s14_s19 = sadd.s32 1, %s529_s19   ;;  %s624_s15 = smov %s521_s17 }
  0xf6   : > { %p11_p7 = scmp.ge.s32.totalorder %s14_s19, 6   ;;  %s625_s16 = smov %s525_s18 }
  0xf7   : > { %s626_s17 = smov %s629_s20  ;;  %s627_s18 = smov %s633_s21 }
  0xf8   :  { %13 = sbr.rel (!%p11_p7) target bundleno = 3 (0x3), region = 69 }

// kernel: grid_attention_forward.2
= control target key start
LH: loop header
LB: loop body
LE: loop exit
PB: predicated region body
PF: predicated region fallthrough
CT: control target
= control target key end

     0   :  { %s1440_s11 = smov 0   ;;  %s1442_s12 = smov 0   ;;  %s1554_s0 = inlined_call_operand.vmem [shape: bf16[2,64,16], index: 0, kind: input, shape index: {}]   ;;  %s1555_s1 = inlined_call_operand.vmem [shape: bf16[16,2], index: 1, kind: input, shape index: {}]   ;;  %s1556_s2 = inlined_call_operand.vmem [shape: bf16[2,16,8], index: 2, kind: input, shape index: {}]   ;;  %s1557_s3 = inlined_call_operand.vmem [shape: bf16[8,2], index: 3, kind: input, shape index: {}]   ;;  %s1558_s4 = inlined_call_operand.vmem [shape: f32[1,2], index: 4, kind: input, shape index: {}]   ;;  %s1559_s5 = inlined_call_operand.vmem [shape: f32[2,4,4], index: 5, kind: input, shape index: {}, may-alias: {5,6}]   ;;  %s1560_s6 = inlined_call_operand.vmem [shape: f32[8,4], index: 6, kind: input, shape index: {}, may-alias: {5,6}]   ;;  %s1561_s7 = inlined_call_operand.vmem [shape: f32[1,2], index: 7, kind: input, shape index: {}]   ;;  %s1562_s8 = inlined_call_operand.<no memory space> [shape: f32[1], index: 8, kind: input, shape index: {}]   ;;  %s1563_s9 = inlined_call_operand.vmem [shape: f32[2,2,4,8], index: 9, kind: output, shape index: {}]  }
   0x1   :  { %14 = sst [smem:[#allocation2]] %s1562_s8  ;;  %s1444_s13 = smov 0  }
   0x2   :  { %s1446_s14 = smov 0   ;;  %s1448_s15 = smov 0  }
   0x3 LB: > { %s29_s8 = sadd.s32 1, %s1370_s13  ;;  %s32_s16 = sadd.s32 1, %s1374_s14  ;;  %s1378_s15 = sphi %s1448_s15, %s20_s15   ;;  %s1374_s14 = sphi %s1446_s14, %s1567_s14   ;;  %s1370_s13 = sphi %s1444_s13, %s1566_s13   ;;  %s1366_s12 = sphi %s1442_s12, %s1565_s12   ;;  %s1362_s11 = sphi %s1440_s11, %s1564_s11  }
   0x4   : > { %p30_p0 = scmp.ge.s32.totalorder %s29_s8, 2  ;;  %p1188_p1 = scmp.ge.s32.totalorder %s1378_s15, 1 }
   0x5   : > { %p328_p2 = scmp.lt.s32.totalorder %s1378_s15, 5 }
   0x6   : > { %s1569_s8 = smov (%p30_p0, %s29_s8), 0  ;;  %s1571_s16 = smov (!%p30_p0, %s32_s16), %s1374_s14 }
   0x7   : > { %p329_p3 = pnand %p1188_p1, %p328_p2  ;;  %p34_p4 = scmp.ge.s32.totalorder %s1571_s16, 2 }
   0x8   : > { %v488_v0 = vld [vmem:[%s1557_s3] sm:$0xf] (!%p329_p3)  ;;  %vm505_vm0 = vcmask (!%p329_p3), 1043456   ;;  %p381_p5 = scmp.lt.s32.totalorder (!%p329_p3), %s1366_s12, 1  ;;  %v1380_v1 = vmov (!%p329_p3), 0.0   ;;  %vm1381_vm1 = vmmov (!%p329_p3), 0   ;;  %v641_v7 = vlaneseq (!%p329_p3) }
   0x9   : > { %s1573_s16 = smov (%p34_p4, %s1571_s16), 0  ;;  %332 = sbr.rel (%p329_p3) target bundleno = 647 (0x287), region = 56 }
   0xa   : > { %1241 = vmatprep.subr.bf16.mxu1 (!%p329_p3), %v1380_v1  ;;  %v507_v2 = vsel (!%p329_p3), %vm505_vm0, %v488_v0, 0  ;;  %1243 = vmatprep.mubr.msk.bf16.mxu1 (!%p329_p3), %vm1381_vm1, %v1380_v1  ;;  %v1321_v3 = vld [vmem:[%s1555_s1] sm:$0xff] (!%p329_p3)   ;;  %s1189_s21 = sshll.u32 (!%p329_p3), %s1362_s11, 2  ;;  %vm501_vm2 = vcmask (!%p329_p3), 64512   ;;  %vm430_vm3 = vcmask (!%p329_p3), 130048   ;;  %p395_p7 = scmp.lt.s32.totalorder (!%p329_p3), %s1362_s11, 1 }
   0xb   : > { %1242 = vmatpush3.bf16.msra.mxu1 (!%p329_p3), %v507_v2  ;;  %1235 = vmatprep.subr.bf16.mxu0 (!%p329_p3), %v1321_v3  ;;  %p383_p6 = scmp.lt.s32.totalorder (!%p329_p3), %s1189_s21, 7  ;;  %v1382_v8 = vmov (!%p329_p3), 1   ;;  %v1383_v9 = vmov (!%p329_p3), 1966171168   ;;  %v1384_v11 = vmov (!%p329_p3), 0   ;;  %v642_v12 = vshrl.u32 (!%p329_p3), %v641_v7, 7 }
   0xc   : > { %1252 = vmatprep.subr.mxu1 (!%p329_p3), %v1380_v1  ;;  %1236 = vmatpush3.bf16.msra.mxu0 (!%p329_p3), %v1321_v3  ;;  %v639_v10 = vunpack.c.l.s4 (!%p329_p3), %v1383_v9  ;;  %v1048_v13 = vand.u32 (!%p329_p3), 127, %v641_v7  ;;  %v1385_v28 = vmov (!%p329_p3), 2   ;;  %v1386_v29 = vmov (!%p329_p3), 3   ;;  %v1202_v30 = vld [vmem:[%s1558_s4] ss:$0 sm:$0xff] (!%p329_p3) }
   0xd   : > { %1247 = vmatprep.subr.mxu0 (!%p329_p3), %v1380_v1  ;;  %1315 = vset.pattern.permute.xlu1 (!%p329_p3), %v1382_v8  ;;  %v656_v17 = vsub.s32 (!%p329_p3), 0, %v642_v12  ;;  %v551_v34 = vld [vmem:[%s1560_s6] sm:$0xff] (!%p329_p3)  ;;  %vm552_vm4 = vcmask (!%p329_p3), 31744   ;;  %vm1000_vm5 = vcmask (!%p329_p3), 15360   ;;  %vm1065_vm6 = vcmask (!%p329_p3), 1041409  }
   0xe   : > { %1314 = vset.pattern.permute.xlu0 (!%p329_p3), %v1384_v11  ;;  %v640_v14 = vunpack.c.0.s8 (!%p329_p3), %v639_v10  ;;  %v1501_v15 = vsub.s32 (!%p329_p3), %v1048_v13, %v642_v12  ;;  %vm1067_vm7 = vcmask (!%p329_p3), 1042434   ;;  %vm1069_vm8 = vcmask (!%p329_p3), 1043459  }
   0xf   : > { %vm1072_vm9 = vcmask (!%p329_p3), 60416  }
  0x10   : > { %s1575_s12 = smov (!%p381_p5, %s1366_s12), 1  ;;  %s1577_s21 = smov (!%p383_p6, %s1189_s21), 7  ;;  %v643_v16 = vsub.s32 %v640_v14, %v642_v12 }
  0x11   : > { %s1190_s22 = sshll.u32 %s1575_s12, 3  ;;  %s1195_s10 = sshll.u32 %s1575_s12, 1 }
  0x12   : > { %s394_s25 = scalar_lea.vmem %s1556_s2, %s1190_s22  ;;  %s386_s26 = sadd.s32 %s1190_s22, %s1577_s21 }
  0x13   : > { %v1320_v4 = vld [vmem:[%s394_s25] sm:$0xff]   ;;  %s1191_s27 = sshll.u32 %s386_s26, 2  ;;  %s1579_s11 = smov (!%p395_p7, %s1362_s11), 1 }
  0x14   : > { %1244 = vmatmul.mubr.msk.bf16.vlgmr.msra.gmra.mrb[0].mxu1 %vm501_vm2, %v1320_v4  ;;  %s388_s30 = scalar_lea.vmem %s1554_s0, %s1191_s27  ;;  %s1194_s17 = sshll.u32 %s1579_s11, 2 }
  0x15   : > { %1254 = vmatprep.mubr.msk.f32.mxu1 %vm1381_vm1, %v1380_v1  ;;  %v1322_v5 = vld [vmem:[%s388_s30] sm:$0xff]   ;;  %v1323_v6 = vld [vmem:[%s388_s30 + $0x8] sm:$0xff]   ;;  %s1503_s18 = sadd.s32 %s1195_s10, %s1579_s11  ;;  %s398_s21 = scalar_lea.vmem %s1559_s5, %s1194_s17 }
  0x16   : > { %1237 = vmatprep.mubr.msk.bf16.mxu0 %vm430_vm3, %v1322_v5  ;;  %v1207_v18 = vld.sshfl [vmem:[%s398_s21] sm:$0x33 pattern:$0x75316420]  ;;  %s1013_s26 = sld [smem:[#allocation2]]  ;;  %s1196_s27 = sshll.u32 %s1503_s18, 2 }
  0x17   : > { %1238 = vmatmul.mubr.msk.bf16.vlgmr.msra.gmra.mrb[0].mxu0 %vm430_vm3, %v1323_v6  ;;  %v644_v19 = vrot.slane %v1207_v18, %v643_v16  ;;  %v637_v20 = vcombine.high %v1207_v18, %v1207_v18  ;;  %s406_s30 = scalar_lea.vmem %s1563_s9, %s1196_s27 }
  0x18   : > { %1249 = vmatprep.mubr.msk.f32.mxu0 %vm1381_vm1, %v1380_v1 }
  0x19   : > { %v657_v21 = vrot.slane %v644_v19, %v656_v17  ;;  %v651_v22 = vrot.slane %v637_v20, %v643_v16  ;;  %v652_v24 = vcombine.high %v644_v19, %v644_v19 }
  0x1b   : > { %764 = vperm.xlu1 %1315, %v657_v21   ;;  %v661_v23 = vrot.slane %v651_v22, %v656_v17  ;;  %671 = vperm.xlu0 %1314, %v657_v21   ;;  %v665_v25 = vrot.slane %v652_v24, %v656_v17  ;;  %v653_v26 = vcombine.high %v651_v22, %v651_v22 }
  0x1d   : > { %v669_v27 = vrot.slane %v653_v26, %v656_v17 }
  0x1f   : > { %768 = vperm.xlu1 %1315, %v661_v23   ;;  %675 = vperm.xlu0 %1314, %v661_v23  }
  0x23   : > { %772 = vperm.xlu1 %1315, %v665_v25   ;;  %679 = vperm.xlu0 %1314, %v665_v25  }
  0x27   : > { %776 = vperm.xlu1 %1315, %v669_v27   ;;  %683 = vperm.xlu0 %1314, %v669_v27  }
  0x2b   : > { %1317 = vset.pattern.permute.xlu1 %v1385_v28  ;;  %1316 = vset.pattern.permute.xlu0 %v1385_v28 }
  0x2c   : > { %865 = vperm.xlu1 %1317, %v661_v23   ;;  %861 = vperm.xlu0 %1316, %v657_v21  }
  0x30   : > { %869 = vperm.xlu1 %1317, %v665_v25   ;;  %873 = vperm.xlu0 %1316, %v669_v27  }
  0x34   : > { %1318 = vset.pattern.permute.xlu1 %v1386_v29  ;;  %1319 = vset.pattern.permute.xlu0 %v1386_v29 }
  0x35   : > { %958 = vperm.xlu1 %1318, %v657_v21   ;;  %962 = vperm.xlu0 %1319, %v661_v23  }
  0x39   : > { %966 = vperm.xlu1 %1318, %v665_v25  }
  0x3d   : > { %970 = vperm.xlu1 %1318, %v669_v27  }
  0x9a   : > { %v765_v44 = vpop.permute.xlu1 %764  ;;  %v672_v47 = vpop.permute.xlu0 %671 }
  0x9e   : > { %v769_v45 = vpop.permute.xlu1 %768  ;;  %v676_v49 = vpop.permute.xlu0 %675 }
  0xa2   : > { %v773_v46 = vpop.permute.xlu1 %772  ;;  %v680_v51 = vpop.permute.xlu0 %679 }
  0xa6   : > { %v777_v48 = vpop.permute.xlu1 %776  ;;  %v684_v53 = vpop.permute.xlu0 %683 }
  0xab   : > { %v866_v50 = vpop.permute.xlu1 %865  ;;  %v862_v55 = vpop.permute.xlu0 %861 }
  0xaf   : > { %v870_v52 = vpop.permute.xlu1 %869  ;;  %v874_v57 = vpop.permute.xlu0 %873 }
  0xb4   : > { %v959_v54 = vpop.permute.xlu1 %958  ;;  %v963_v8 = vpop.permute.xlu0 %962 }
  0xb8   : > { %v967_v56 = vpop.permute.xlu1 %966 }
  0xbc   : > { %v971_v6 = vpop.permute.xlu1 %970 }
  0xe7   : > { %v543_v31 = vpop.f32.mrb[0].mxu1 }
  0xe8   : > { %v544_v32 = vadd.f32 %v1202_v30, %v543_v31  ;;  %v1245_v33 = vpop.f32.mrb[1].mxu1 }
  0xe9   : > { %v546_v35 = vpop.f32.mrb[2].mxu1 }
  0xea   : > { %v690_v36 = vrot.slane %v544_v32, 4  ;;  %v547_v37 = vadd.f32 %v1202_v30, %v546_v35  ;;  %v1246_v38 = vpop.f32.mrb[3].mxu1  ;;  %1248 = vmatpush3.msk.msra.mxu0 %vm505_vm0, %v544_v32  ;;  %v1239_v40 = vpop.f32.mrb[0].mxu0 }
  0xeb   : > { %1250 = vmatmul.mubr.msk.f32.vlgmr.msra.gmra.mrb[4].mxu0 %vm552_vm4, %v551_v34  ;;  %1257 = vmatprep.subr.mxu0 %v1380_v1  ;;  %v471_v41 = vpop.f32.mrb[1].mxu0 }
  0xec   : > { %v884_v39 = vrot.slane %v547_v37, 4  ;;  %1253 = vmatpush3.msk.msra.mxu1 %vm505_vm0, %v690_v36  ;;  %1258 = vmatpush3.msk.msra.mxu0 %vm505_vm0, %v547_v37  ;;  %v1240_v42 = vpop.f32.mrb[2].mxu0  ;;  %v1214_v37 = vld [vmem:[%s1561_s7] ss:$0 sm:$0xff] }
  0xed   : > { %1255 = vmatmul.mubr.msk.f32.vlgmr.msra.gmra.mrb[4].mxu1 %vm552_vm4, %v551_v34  ;;  %1262 = vmatprep.subr.mxu1 %v1380_v1  ;;  %v474_v43 = vpop.f32.mrb[3].mxu0 }
  0xee   : > { %1259 = vmatprep.mubr.msk.f32.mxu0 %vm1381_vm1, %v1380_v1  ;;  %1263 = vmatpush3.msk.msra.mxu1 %vm505_vm0, %v884_v39 }
  0xef   : > { %1260 = vmatmul.mubr.msk.f32.vlgmr.msra.gmra.mrb[6].mxu0 %vm552_vm4, %v551_v34  ;;  %1264 = vmatprep.mubr.msk.f32.mxu1 %vm1381_vm1, %v1380_v1 }
  0xf1   : > { %1265 = vmatmul.mubr.msk.f32.vlgmr.msra.gmra.mrb[6].mxu1 %vm552_vm4, %v551_v34 }
 0x1be   : > { %v625_v58 = vpop.f32.mrb[4].mxu0 }
 0x1bf   : > { %v1251_v59 = vpop.f32.mrb[5].mxu0  ;;  %v686_v60 = vmul.f32 %v672_v47, %v625_v58  ;;  %v687_v61 = vmul.f32 %v676_v49, %v625_v58  ;;  %v688_v62 = vmul.f32 %v680_v51, %v625_v58  ;;  %v689_v63 = vmul.f32 %v684_v53, %v625_v58 }
 0x1c0   : > { %v759_v0 = vpop.f32.mrb[4].mxu1 }
 0x1c1   : > { %v779_v1 = vmul.f32 %v765_v44, %v759_v0  ;;  %v780_v2 = vmul.f32 %v769_v45, %v759_v0  ;;  %v781_v3 = vmul.f32 %v773_v46, %v759_v0  ;;  %v782_v4 = vmul.f32 %v777_v48, %v759_v0  ;;  %v1256_v5 = vpop.f32.mrb[5].mxu1 }
 0x1c2   : > { %v856_v7 = vpop.f32.mrb[6].mxu0 }
 0x1c3   : > { %v783_v9 = vadd.f32 %v779_v1, %v686_v60  ;;  %v784_v10 = vadd.f32 %v780_v2, %v687_v61  ;;  %v785_v11 = vadd.f32 %v781_v3, %v688_v62  ;;  %v786_v12 = vadd.f32 %v782_v4, %v689_v63  ;;  %v1261_v13 = vpop.f32.mrb[7].mxu0 }
 0x1c4   : > { %v876_v14 = vmul.f32 %v862_v55, %v856_v7  ;;  %v877_v16 = vmul.f32 %v866_v50, %v856_v7  ;;  %v878_v17 = vmul.f32 %v870_v52, %v856_v7  ;;  %v879_v18 = vmul.f32 %v874_v57, %v856_v7  ;;  %v953_v19 = vpop.f32.mrb[6].mxu1 }
 0x1c5   : > { %v973_v20 = vmul.f32 %v959_v54, %v953_v19  ;;  %v974_v21 = vmul.f32 %v963_v8, %v953_v19  ;;  %v975_v22 = vmul.f32 %v967_v56, %v953_v19  ;;  %v976_v23 = vmul.f32 %v971_v6, %v953_v19  ;;  %v1266_v24 = vpop.f32.mrb[7].mxu1 }
 0x1c6   : > { %v880_v25 = vadd.f32 %v876_v14, %v783_v9  ;;  %v881_v26 = vadd.f32 %v877_v16, %v784_v10  ;;  %v882_v27 = vadd.f32 %v878_v17, %v785_v11  ;;  %v883_v28 = vadd.f32 %v879_v18, %v786_v12 }
 0x1c8   : > { %v978_v29 = vadd.f32 %v974_v21, %v881_v26  ;;  %v977_v30 = vadd.f32 %v973_v20, %v880_v25  ;;  %v979_v31 = vadd.f32 %v975_v22, %v882_v27  ;;  %v980_v32 = vadd.f32 %v976_v23, %v883_v28 }
 0x1ca   : > { %v982_v33 = vadd.f32 %v978_v29, %v474_v43  ;;  %v981_v34 = vadd.f32 %v977_v30, %v471_v41  ;;  %v983_v35 = vadd.f32 %v1239_v40, %v979_v31  ;;  %v984_v36 = vadd.f32 %v1240_v42, %v980_v32 }
 0x1cb   : > { %v1014_v42 = vstv %s1013_s26 }
 0x1cc   : > { %v986_v38 = vmax.f32 %v982_v33, 0.0  ;;  %v985_v39 = vmax.f32 %v981_v34, 0.0  ;;  %v987_v44 = vmax.f32 %v983_v35, 0.0  ;;  %v988_v50 = vmax.f32 %v984_v36, 0.0 }
 0x1ce   : > { %v997_v45 = vmul.f32 %v1214_v37, %v986_v38  ;;  %v996_v46 = vmul.f32 %v1214_v37, %v985_v39  ;;  %v998_v49 = vmul.f32 %v1214_v37, %v987_v44  ;;  %v999_v41 = vmul.f32 %v1214_v37, %v988_v50 }
 0x1d0   : > { %v1004_v47 = vsel %vm1000_vm5, %v997_v45, 0.0  ;;  %v1001_v48 = vsel %vm1000_vm5, %v996_v46, 0.0  ;;  %v1007_v43 = vsel %vm1000_vm5, %v998_v49, 0.0  ;;  %v1010_v40 = vsel %vm1000_vm5, %v999_v41, 0.0 }
 0x1d1   : > { %1005 = vadd.xlane.f32.xlu1 %v1004_v47  ;;  %1002 = vadd.xlane.f32.xlu0 %v1001_v48 }
 0x1d5   : > { %1008 = vadd.xlane.f32.xlu0 %v1007_v43 }
 0x1d9   : > { %1011 = vadd.xlane.f32.xlu0 %v1010_v40 }
 0x25e   : > { %v1006_v51 = vpop.xlane.xlu1 %1005  ;;  %v1003_v52 = vpop.xlane.xlu0 %1002 }
 0x25f   : > { %v1016_v53 = vadd.f32 %v1014_v42, %v1006_v51  ;;  %v1015_v54 = vadd.f32 %v1014_v42, %v1003_v52 }
 0x261   : > { %v1216_v55 = vmul.f32 -1.442695, %v1016_v53  ;;  %v1215_v56 = vmul.f32 -1.442695, %v1015_v54 }
 0x262   : > { %v1009_v57 = vpop.xlane.xlu0 %1008 }
 0x263   : > { %1324 = vpow2.f32 %v1216_v55  ;;  %v1017_v58 = vadd.f32 %v1014_v42, %v1009_v57 }
 0x264   : > { %1326 = vpow2.f32 %v1215_v56 }
 0x265   : > { %v1217_v59 = vmul.f32 -1.442695, %v1017_v58 }
 0x266   : > { %v1012_v60 = vpop.xlane.xlu0 %1011 }
 0x267   : > { %1328 = vpow2.f32 %v1217_v59  ;;  %v1018_v61 = vadd.f32 %v1014_v42, %v1012_v60 }
 0x269   : > { %v1218_v62 = vmul.f32 -1.442695, %v1018_v61 }
 0x26b   : > { %1330 = vpow2.f32 %v1218_v62 }
 0x26d   : > { %v1325_v63 = vpop.eup %1324 }
 0x26e   : > { %v1327_v0 = vpop.eup %1326  ;;  %v1032_v1 = vadd.f32 1.0, %v1325_v63 }
 0x26f   : > { %v1031_v2 = vadd.f32 1.0, %v1327_v0 }
 0x270   : > { %1332 = vrcp.f32 %v1032_v1 }
 0x271   : > { %v1329_v3 = vpop.eup %1328  ;;  %1334 = vrcp.f32 %v1031_v2 }
 0x272   : > { %v1033_v4 = vadd.f32 1.0, %v1329_v3 }
 0x274   : > { %1336 = vrcp.f32 %v1033_v4 }
 0x275   : > { %v1331_v5 = vpop.eup %1330 }
 0x276   : > { %v1034_v6 = vadd.f32 1.0, %v1331_v5 }
 0x278   : > { %1338 = vrcp.f32 %v1034_v6 }
 0x27a   : > { %v1333_v7 = vpop.eup %1332 }
 0x27b   : > { %v1335_v8 = vpop.eup %1334  ;;  %v1056_v10 = vrot.slane %v1333_v7, %v1501_v15 }
 0x27c   : > { %v1052_v11 = vrot.slane %v1335_v8, %v1501_v15 }
 0x27e   : > { %v1337_v9 = vpop.eup %1336  ;;  %v1066_v14 = vsel %vm1065_vm6, %v1056_v10, %v1052_v11 }
 0x27f   : > { %v1060_v12 = vrot.slane %v1337_v9, %v1501_v15 }
 0x281   : > { %v1068_v17 = vsel %vm1067_vm7, %v1060_v12, %v1066_v14 }
 0x282   : > { %v1339_v13 = vpop.eup %1338 }
 0x283   : > { %v1064_v16 = vrot.slane %v1339_v13, %v1501_v15 }
 0x285   : > { %v1070_v18 = vsel %vm1069_vm8, %v1064_v16, %v1068_v17 }
 0x286   : > { %1073 = vst.msk [vmem:[%s406_s30] sm:$0xf] %vm1072_vm9, %v1070_v18 }
 0x287 PF: > { %s20_s15 = sadd.s32 1, %s1378_s15   ;;  %s1564_s11 = smov %s1370_s13 }
 0x288   : > { %p17_p8 = scmp.ge.s32.totalorder %s20_s15, 6   ;;  %s1565_s12 = smov %s1374_s14 }
 0x289   : > { %s1566_s13 = smov %s1569_s8  ;;  %s1567_s14 = smov %s1573_s16 }
 0x28a   :  { %19 = sbr.rel (!%p17_p8) target bundleno = 3 (0x3), region = 92 }

</bundles_post_ra>
